<compile_context>
chip_gen: v5e
topology: v5e:2x2
jax: 0.10.0
libtpu: 0.0.40
codegen_flags: <defaults>
</compile_context>

<pallas_src>
import jax
import jax.numpy as jnp
from jax.experimental import pallas as pl
from jax.experimental.pallas import tpu as pltpu

LANES = 128            # lane width: output last dim exactly 128 -> unmasked vst
MAX_BLOCK_ROWS = 4096  # 4096 x 128 x 4 B = 2 MiB f32 per array per block
MIN_BLOCK_ROWS = 1024  # 512 KiB floor when splitting for pipelining
TARGET_STEPS = 4       # >= 4 grid steps so both v7x TCs double-buffer


def _add2_kernel(a_ref, b_ref, c_ref):
    # Hot path: square both inputs and add, entirely in VMEM on the VPU.
    a = a_ref[...]
    b = b_ref[...]
    c_ref[...] = a * a + b * b


def _pick_block_rows(rows):
    """Pick a sublane-aligned row-block size for a (rows, 128) f32 array."""
    if rows < 8:
        # Block equal to the full dim is always legal (no (8,128) padding rule).
        return rows
    br = (rows + TARGET_STEPS - 1) // TARGET_STEPS   # aim for >= 4 steps
    br = ((br + 7) // 8) * 8                         # sublane multiple of 8
    if rows >= MIN_BLOCK_ROWS * TARGET_STEPS:
        br = max(br, MIN_BLOCK_ROWS)                 # keep blocks >= 512 KiB
    return max(8, min(br, MAX_BLOCK_ROWS))           # cap at 2 MiB per array


def add_model_forward(a, b):
    """Computes square(a) + square(b) with a Pallas TPU kernel.

    a, b: 1-D float32 arrays of any length n. Padding is only to the next
    multiple of 128 lanes (none when n % 128 == 0); the ragged last row-block
    is handled by Pallas' partial-block masking, not by materialized padding.
    """
    n = a.shape[0]
    rem = n % LANES
    if rem:
        pad = LANES - rem
        a = jnp.pad(a, (0, pad))
        b = jnp.pad(b, (0, pad))
    rows = (n + LANES - 1) // LANES
    a2d = a.reshape(rows, LANES)
    b2d = b.reshape(rows, LANES)

    block_rows = _pick_block_rows(rows)
    grid = (pl.cdiv(rows, block_rows),)   # last block may be partial; masked
    spec = pl.BlockSpec((block_rows, LANES), lambda i: (i, 0))

    c2d = pl.pallas_call(
        _add2_kernel,
        out_shape=jax.ShapeDtypeStruct((rows, LANES), a.dtype),
        grid_spec=pltpu.PrefetchScalarGridSpec(
            num_scalar_prefetch=0,
            grid=grid,
            in_specs=[spec, spec],
            out_specs=spec,
        ),
        compiler_params=pltpu.CompilerParams(
            dimension_semantics=("parallel",),
            vmem_limit_bytes=32 * 1024 * 1024,   # v5e default (16 MiB) is too tight for 2 MiB blocks
            allow_input_fusion=[True, True],     # fuse pad/reshape producers into the input DMA
        ),
        cost_estimate=pl.CostEstimate(
            flops=3 * n, transcendentals=0, bytes_accessed=12 * n),
    )(a2d, b2d)

    c = c2d.reshape(rows * LANES)
    return c[:n] if rem else c


if __name__ == "__main__":
    key = jax.random.PRNGKey(0)
    ka, kb, ka2, kb2 = jax.random.split(key, 4)

    # Small case matching the AddModel(n) test harness (parameters ~ N(0, 1)).
    # n is a multiple of 128 -> zero padding, single (8, 128) block.
    n_small = 1024
    a = jax.random.normal(ka, (n_small,), dtype=jnp.float32)
    b = jax.random.normal(kb, (n_small,), dtype=jnp.float32)
    c = jax.block_until_ready(add_model_forward(a, b))
    ref = jnp.square(a) + jnp.square(b)
    assert jnp.allclose(c, ref, atol=1e-6, rtol=1e-6)

    # Ragged case: exercises lane padding, a multi-step grid (>= 4 steps for
    # v7x megacore pipelining) and Pallas' partial last row-block masking.
    n_ragged = 100_000
    a2 = jax.random.normal(ka2, (n_ragged,), dtype=jnp.float32)
    b2 = jax.random.normal(kb2, (n_ragged,), dtype=jnp.float32)
    c2 = jax.block_until_ready(add_model_forward(a2, b2))
    ref2 = jnp.square(a2) + jnp.square(b2)
    assert jnp.allclose(c2, ref2, atol=1e-6, rtol=1e-6)

    print("KERNEL_OK")
</pallas_src>

<mosaic_0001>
module attributes {stable_mosaic.version = 11 : i64} {
  func.func @_add2_kernel(%arg0: i32, %arg1: memref<8x128xf32, #tpu.memory_space<vmem>>, %arg2: memref<8x128xf32, #tpu.memory_space<vmem>>, %arg3: memref<8x128xf32, #tpu.memory_space<vmem>>) attributes {dimension_semantics = [#tpu.dimension_semantics<parallel>], iteration_bounds = array<i64: 1>, scalar_prefetch = 0 : i64, scratch_operands = 0 : i64, tpu.core_type = #tpu.core_type<tc>, window_params = [{transform_indices = @transform_0, window_bounds = array<i64: 8, 128>}, {transform_indices = @transform_1, window_bounds = array<i64: 8, 128>}, {transform_indices = @transform_2, window_bounds = array<i64: 8, 128>}]} {
    %c0 = arith.constant 0 : index
    %c0_0 = arith.constant 0 : index
    %0 = vector.load %arg1[%c0, %c0_0] : memref<8x128xf32, #tpu.memory_space<vmem>>, vector<8x128xf32>
    %c0_1 = arith.constant 0 : index
    %c0_2 = arith.constant 0 : index
    %1 = vector.load %arg2[%c0_1, %c0_2] : memref<8x128xf32, #tpu.memory_space<vmem>>, vector<8x128xf32>
    %2 = arith.mulf %0, %0 : vector<8x128xf32>
    %3 = arith.mulf %1, %1 : vector<8x128xf32>
    %4 = arith.addf %2, %3 : vector<8x128xf32>
    %c0_3 = arith.constant 0 : index
    %c0_4 = arith.constant 0 : index
    %5 = vector.load %arg3[%c0_3, %c0_4] : memref<8x128xf32, #tpu.memory_space<vmem>>, vector<8x128xf32>
    tpu.vector_store %arg3[%c0_3, %c0_4], %4 {strides = array<i32>} : memref<8x128xf32, #tpu.memory_space<vmem>>, vector<8x128xf32>,
    return
  }
  func.func @transform_0(%arg0: i32) -> (i32, i32) {
    %c0_i32 = arith.constant 0 : i32
    %c0_i32_0 = arith.constant 0 : i32
    return %arg0, %c0_i32 : i32, i32
  }
  func.func @transform_1(%arg0: i32) -> (i32, i32) {
    %c0_i32 = arith.constant 0 : i32
    %c0_i32_0 = arith.constant 0 : i32
    return %arg0, %c0_i32 : i32, i32
  }
  func.func @transform_2(%arg0: i32) -> (i32, i32) {
    %c0_i32 = arith.constant 0 : i32
    %c0_i32_0 = arith.constant 0 : i32
    return %arg0, %c0_i32 : i32, i32
  }
}

</mosaic_0001>

<bundles_post_ra>
// kernel: tpu_custom_call.1
= control target key start
LH: loop header
LB: loop body
LE: loop exit
PB: predicated region body
PF: predicated region fallthrough
CT: control target
= control target key end

     0   :  { %7 = vsyncpa [#allocation3], 0  ;;  %s172_s0 = inlined_call_operand.hbm [shape: f32[8,128], index: 0, kind: input, shape index: {}]   ;;  %s173_s1 = inlined_call_operand.hbm [shape: f32[8,128], index: 1, kind: input, shape index: {}]   ;;  %s174_s2 = inlined_call_operand.hbm [shape: f32[8,128], index: 2, kind: output, shape index: {}]  }
   0x1   :  { %8 = vsyncpa [#allocation6], 0 }
   0x2   :  { %9 = vsyncpa [#allocation4], 0  ;;  %s15_s11 = sshll.u32 %s172_s0, 4  ;;  %s145_s12 = smov [#allocation2]   ;;  %s16_s11 = int_to_ptr.hbm [resolvable:$true] %s15_s11 }
   0x3   :  { %s17_s13 = sshll.u32 %s145_s12, 4  ;;  %s26_s16 = sshll.u32 %s173_s1, 4  ;;  %s18_s13 = int_to_ptr.vmem [resolvable:$true] %s17_s13  ;;  %s27_s16 = int_to_ptr.hbm [resolvable:$true] %s26_s16 }
   0x4   :  { %20 = dma.hbm_to_vmem [thread:$0]  %s16_s11, 128, %s18_s13, [#allocation3]  }
   0x5   :  { %s146_s17 = smov [#allocation5]  }
   0x6   :  { %s28_s18 = sshll.u32 %s146_s17, 4  ;;  %s29_s18 = int_to_ptr.vmem [resolvable:$true] %s28_s18 }
   0x7   :  { %31 = dma.hbm_to_vmem [thread:$0]  %s27_s16, 128, %s29_s18, [#allocation6]  }
   0x8   :  { %139 = dma.done.wait [#allocation3], 128  }
   0x9   :  { %140 = vsyncadd [#allocation3], 4294967168 }
   0xa   :  { %141 = dma.done.wait [#allocation6], 128  }
   0xb   :  { %142 = vsyncadd [#allocation6], 4294967168  ;;  %v40_v0 = vld [vmem:[#allocation2] sm:$0xff]  ;;  %v41_v1 = vld [vmem:[#allocation5] sm:$0xff]  ;;  %s147_s0 = smov [#allocation7]   ;;  %s53_s22 = sshll.u32 %s174_s2, 4  ;;  %s54_s22 = int_to_ptr.hbm [resolvable:$true] %s53_s22 }
   0xc   :  { %s51_s19 = sshll.u32 %s147_s0, 4  ;;  %v42_v2 = vmul.f32 %v40_v0, %v40_v0  ;;  %v43_v3 = vmul.f32 %v41_v1, %v41_v1  ;;  %s52_s19 = int_to_ptr.vmem [resolvable:$true] %s51_s19 }
   0xe   :  { %v44_v4 = vadd.f32 %v43_v3, %v42_v2 }
  0x10   :  { %45 = vst [vmem:[#allocation7] sm:$0xff] %v44_v4 }
  0x11   :  { %56 = dma.vmem_to_hbm [thread:$0]  %s52_s19, 128, %s54_s22, [#allocation4]  }
  0x12   :  { %143 = dma.done.wait [#allocation4], 128  }
  0x13   :  { %144 = vsyncadd [#allocation4], 4294967168 }
  0x14   :  { %61 = vsyncpa [#allocation3], 1 }
  0x15   :  { %62 = vsyncpa [#allocation6], 1 }
  0x16   :  { %63 = vsyncpa [#allocation4], 1 }

</bundles_post_ra>
